<compile_context>
chip_gen: v6e
topology: v6e:2x2x1
jax: 0.10.0
libtpu: 0.0.40
codegen_flags: <defaults>
</compile_context>

<pallas_src>
import jax
import jax.numpy as jnp
import numpy as np
from jax import lax
from jax.experimental import pallas as pl
from jax.experimental.pallas import tpu as pltpu


def _round_up(a, m):
    return (a + m - 1) // m * m


def _bilinear_kernel(meta_ref, wpos_ref, gind_ref, scene_t_ref, out_ref):
    """meta_ref:    (8, Nt)   f32  rows = [row1, row2, x1, x2, wr1, wr2, wc1, wc2]
                                   (row = sid*H + y; wr* are the x-weights the
                                    module attaches to the y-rows, wc* are the
                                    y-weights it attaches to the x-columns)
       wpos_ref:    (CWp, 1)  i32  sublane j -> j % W for j < C*W, else -1
       gind_ref:    (C, CWp)  f32  channel indicator: 1 where j // W == c
       scene_t_ref: (CWp, BHp) f32 scene[b,c,h,w] at [c*W+w, b*H+h], zero-padded
       out_ref:     (C, Nt)   f32"""
    meta = meta_ref[...]
    row1 = meta[0:1, :].astype(jnp.int32)
    row2 = meta[1:2, :].astype(jnp.int32)
    x1 = meta[2:3, :].astype(jnp.int32)
    x2 = meta[3:4, :].astype(jnp.int32)
    wr1 = meta[4:5, :]
    wr2 = meta[5:6, :]
    wc1 = meta[6:7, :]
    wc2 = meta[7:8, :]

    nt = meta.shape[1]
    cwp, bhp = scene_t_ref.shape

    # Stage 1: row (y) selection carrying the x-weights, as an MXU contraction
    # over the B*H axis.  Sublane iota vs. a sublane splat of the (1, Nt) row
    # indices is cheap VPU work; coincident rows (y1 == y2) correctly sum.
    i_bh = lax.broadcasted_iota(jnp.int32, (bhp, nt), 0)
    sel = (jnp.where(i_bh == row1, wr1, 0.0)
           + jnp.where(i_bh == row2, wr2, 0.0))                   # (BHp, Nt)
    t = jnp.dot(scene_t_ref[...], sel,
                preferred_element_type=jnp.float32)               # (CWp, Nt)

    # Stage 2: column (x) selection carrying the y-weights (VPU mask, using the
    # hoisted w-position table), then a small (C, CWp) indicator matmul reduces
    # the W positions of each channel into a lane-dense (C, Nt) output block.
    wpos = wpos_ref[...]                                          # (CWp, 1)
    xw = (jnp.where(wpos == x1, wc1, 0.0)
          + jnp.where(wpos == x2, wc2, 0.0))                      # (CWp, Nt)
    p = t * xw
    out_ref[...] = jnp.dot(gind_ref[...], p,
                           preferred_element_type=jnp.float32)    # (C, Nt)


def prepare_scene(scene):
    """Relayout the (B, C, H, W) scene into the kernel's VMEM-resident
    (C*W, B*H) block (zero-padded to (8, 128) multiples) plus the two
    grid-invariant constant tables.  Reuse the result when the same scene is
    interpolated repeatedly so the relayout is not paid per call."""
    B, C, H, W = scene.shape
    cw, bh = C * W, B * H
    cwp = _round_up(cw, 8)
    bhp = _round_up(bh, 128)

    scene_t = jnp.transpose(scene.astype(jnp.float32), (1, 3, 0, 2))  # (C,W,B,H)
    scene_t = scene_t.reshape(cw, bh)
    scene_t = jnp.pad(scene_t, ((0, cwp - cw), (0, bhp - bh)))

    j = np.arange(cwp)
    wpos = np.where(j < cw, j % W, -1).astype(np.int32).reshape(cwp, 1)
    gind = np.zeros((C, cwp), np.float32)
    gind[np.repeat(np.arange(C), W), np.arange(cw)] = 1.0

    return dict(scene_t=scene_t, wpos=jnp.asarray(wpos), gind=jnp.asarray(gind),
                B=B, C=C, H=H, W=W, cwp=cwp, bhp=bhp)


def _pick_n_tile(n_points):
    # v6e/v7x have a 2x256x256 MXU: Nt=256 fills the lane dimension of the
    # stage-1 contraction and halves the per-grid-step overhead, but only once
    # there are enough points to keep >= 2 grid tiles (megacore sharding).
    # v5e's MXUs are 128x128, so 128 already fills them and 256 only adds
    # vreg/VMEM spill against its single vector-store slot.
    if n_points < 512:
        return 128
    try:
        kind = jax.devices()[0].device_kind.lower()
    except Exception:
        return 128
    if "v5 lite" in kind or "v5e" in kind:
        return 128
    return 256


def bilinear_interpolation(location, scene, scene_idx, scene_distance=56.0,
                           n_tile=None, prepared=None):
    """location: (N, 2) f32, scene: (B, C, H, W), scene_idx: (N,) int.
    Returns (interp_scene (N, C) f32, (x, y)) — same as the PyTorch forward.
    Pass `prepared=prepare_scene(scene)` to amortize the scene relayout across
    repeated calls with the same scene."""
    if prepared is None:
        prepared = prepare_scene(scene)
    C, H, W = prepared["C"], prepared["H"], prepared["W"]
    cwp, bhp = prepared["cwp"], prepared["bhp"]

    N = location.shape[0]
    if n_tile is None:
        n_tile = _pick_n_tile(N)

    sd = jnp.float32(scene_distance)
    loc = location.astype(jnp.float32)
    x = W * (loc[:, 0:1] + sd) / (2.0 * sd)                       # (N, 1)
    y = H * (loc[:, 1:2] + sd) / (2.0 * sd)

    x_ = jnp.clip(x + 1.0, 1e-5, W + 1 - 1e-5)
    y_ = jnp.clip(y + 1.0, 1e-5, H + 1 - 1e-5)
    x1 = jnp.floor(x_)
    x2 = jnp.ceil(x_)
    y1 = jnp.floor(y_)
    y2 = jnp.ceil(y_)

    # Indexing the replicate-padded scene at integer i is identical to
    # indexing the unpadded scene at clamp(i - 1, 0, dim - 1).
    x1i = jnp.clip(x1.astype(jnp.int32) - 1, 0, W - 1)
    x2i = jnp.clip(x2.astype(jnp.int32) - 1, 0, W - 1)
    y1i = jnp.clip(y1.astype(jnp.int32) - 1, 0, H - 1)
    y2i = jnp.clip(y2.astype(jnp.int32) - 1, 0, H - 1)

    sid = scene_idx.astype(jnp.int32).reshape(N, 1)
    row1 = sid * H + y1i
    row2 = sid * H + y2i

    # The module's weights are cross-swapped: y-rows carry the x-weights and
    # x-columns carry the y-weights (see header comment).
    wr1 = x2 - x_                        # x-weight attached to row y1
    wr2 = x_ - x1                        # x-weight attached to row y2
    wc1 = y2 - y_                        # y-weight attached to column x1
    wc2 = y_ - y1                        # y-weight attached to column x2

    f32 = jnp.float32
    meta = jnp.concatenate(
        [row1.astype(f32), row2.astype(f32), x1i.astype(f32), x2i.astype(f32),
         wr1.astype(f32), wr2.astype(f32), wc1.astype(f32), wc2.astype(f32)],
        axis=1)                                                   # (N, 8)
    Np = max(_round_up(N, n_tile), n_tile)
    meta = jnp.pad(meta.T, ((0, 0), (0, Np - N)))                 # (8, Np), padded
    # padded points have zero weights -> contribute nothing; sliced off anyway.

    scene_t, wpos, gind = prepared["scene_t"], prepared["wpos"], prepared["gind"]

    # VMEM budget from actual buffer sizes (scene is double-buffered by
    # BlockSpec even though its index_map is constant) plus the per-tile
    # intermediates, with headroom.
    scene_bytes = cwp * bhp * 4
    tile_bytes = 2 * (8 * n_tile * 4 + C * n_tile * 4)            # meta + out, x2 bufs
    const_bytes = 2 * (cwp * 4 + C * cwp * 4)                     # wpos + gind, x2 bufs
    inter_bytes = (bhp + 3 * cwp) * n_tile * 4                    # sel, t, xw, p
    vmem_limit = 2 * scene_bytes + tile_bytes + const_bytes + 2 * inter_bytes
    vmem_limit = min(max(int(vmem_limit * 1.5) + (4 << 20), 8 << 20), 100 << 20)
    assert 2 * scene_bytes <= 48 * 1024 * 1024, (
        "scene too large for the VMEM-resident contraction path")
    # TODO(synk): for scenes whose (C*W, B*H) layout exceeds VMEM (hits first on
    # v7x's 64 MiB), switch stage 1 to a scalar-prefetch row-gather
    # (PrefetchScalarGridSpec + manual DMA of the two needed rows per point)
    # and single-buffer the resident scene instead of the dense contraction.

    cost = pl.CostEstimate(
        flops=2 * Np * cwp * (bhp + C),
        transcendentals=0,
        bytes_accessed=scene_bytes + (8 + C) * Np * 4 + const_bytes // 2)

    out = pl.pallas_call(
        _bilinear_kernel,
        out_shape=jax.ShapeDtypeStruct((C, Np), jnp.float32),
        grid_spec=pltpu.PrefetchScalarGridSpec(
            num_scalar_prefetch=0,
            grid=(Np // n_tile,),
            in_specs=[
                pl.BlockSpec((8, n_tile), lambda i: (0, i)),      # packed meta
                pl.BlockSpec((cwp, 1), lambda i: (0, 0)),         # wpos (const)
                pl.BlockSpec((C, cwp), lambda i: (0, 0)),         # gind (const)
                pl.BlockSpec((cwp, bhp), lambda i: (0, 0)),       # scene (resident)
            ],
            out_specs=pl.BlockSpec((C, n_tile), lambda i: (0, i)),
        ),
        compiler_params=pltpu.CompilerParams(
            dimension_semantics=("parallel",),
            vmem_limit_bytes=vmem_limit),
        cost_estimate=cost,
    )(meta, wpos, gind, scene_t)

    return out[:, :N].T, (x, y)


def _reference(location, scene, scene_idx, scene_distance=56.0):
    """Pure-JAX transcription of the PyTorch forward (for verification)."""
    B, C, H, W = scene.shape
    loc = location.astype(jnp.float32)
    x = W * (loc[:, 0:1] + scene_distance) / (2.0 * scene_distance)
    y = H * (loc[:, 1:2] + scene_distance) / (2.0 * scene_distance)
    pad = jnp.pad(scene, ((0, 0), (0, 0), (1, 1), (1, 1)), mode="edge")
    x_ = jnp.clip(x + 1, 1e-5, W + 1 - 1e-5)
    y_ = jnp.clip(y + 1, 1e-5, H + 1 - 1e-5)
    x1 = jnp.floor(x_); x2 = jnp.ceil(x_)
    y1 = jnp.floor(y_); y2 = jnp.ceil(y_)
    x1i = x1.astype(jnp.int32)[:, 0]; x2i = x2.astype(jnp.int32)[:, 0]
    y1i = y1.astype(jnp.int32)[:, 0]; y2i = y2.astype(jnp.int32)[:, 0]
    sid = scene_idx.astype(jnp.int32)
    q11 = pad[sid, :, y1i, x1i]; q12 = pad[sid, :, y1i, x2i]
    q21 = pad[sid, :, y2i, x1i]; q22 = pad[sid, :, y2i, x2i]
    interp = (q11 * ((x2 - x_) * (y2 - y_)) + q21 * ((x_ - x1) * (y2 - y_))
              + q12 * ((x2 - x_) * (y_ - y1)) + q22 * ((x_ - x1) * (y_ - y1)))
    return interp, (x, y)


if __name__ == "__main__":
    key = jax.random.PRNGKey(0)
    scene_distance = 56.0
    configs = [
        dict(N=200, B=2, C=4, H=16, W=16),   # multi-channel path
        dict(N=96,  B=3, C=1, H=16, W=16),   # single-channel path
    ]
    for cfg in configs:
        key, k1, k2, k3 = jax.random.split(key, 4)
        location = jax.random.uniform(k1, (cfg["N"], 2), jnp.float32,
                                      minval=-60.0, maxval=60.0)
        scene = jax.random.normal(
            k2, (cfg["B"], cfg["C"], cfg["H"], cfg["W"]), jnp.float32)
        scene_idx = jax.random.randint(k3, (cfg["N"],), 0, cfg["B"],
                                       dtype=jnp.int32)

        prepared = prepare_scene(scene)   # relayout hoisted out of the hot path
        interp, (x, y) = bilinear_interpolation(location, scene, scene_idx,
                                                scene_distance,
                                                prepared=prepared)
        interp = jax.block_until_ready(interp)

        ref_interp, (rx, ry) = _reference(location, scene, scene_idx,
                                          scene_distance)
        np.testing.assert_allclose(np.asarray(interp), np.asarray(ref_interp),
                                   rtol=1e-4, atol=1e-4)
        np.testing.assert_allclose(np.asarray(x), np.asarray(rx),
                                   rtol=1e-6, atol=1e-6)
        np.testing.assert_allclose(np.asarray(y), np.asarray(ry),
                                   rtol=1e-6, atol=1e-6)
    print("KERNEL_OK")
</pallas_src>

<mosaic_0001>
module attributes {stable_mosaic.version = 11 : i64} {
  func.func @_bilinear_kernel(%arg0: i32, %arg1: memref<8x128xf32, #tpu.memory_space<vmem>>, %arg2: memref<64x1xi32, #tpu.memory_space<vmem>>, %arg3: memref<4x64xf32, #tpu.memory_space<vmem>>, %arg4: memref<64x128xf32, #tpu.memory_space<vmem>>, %arg5: memref<4x128xf32, #tpu.memory_space<vmem>>) attributes {dimension_semantics = [#tpu.dimension_semantics<parallel>], iteration_bounds = array<i64: 2>, scalar_prefetch = 0 : i64, scratch_operands = 0 : i64, tpu.core_type = #tpu.core_type<tc>, window_params = [{transform_indices = @transform_0, window_bounds = array<i64: 8, 128>}, {pipeline_mode = #tpu.pipeline_mode<synchronous>, transform_indices = @transform_1, window_bounds = array<i64: 64, 1>}, {pipeline_mode = #tpu.pipeline_mode<synchronous>, transform_indices = @transform_2, window_bounds = array<i64: 4, 64>}, {pipeline_mode = #tpu.pipeline_mode<synchronous>, transform_indices = @transform_3, window_bounds = array<i64: 64, 128>}, {transform_indices = @transform_4, window_bounds = array<i64: 4, 128>}]} {
    %c0 = arith.constant 0 : index
    %c0_0 = arith.constant 0 : index
    %0 = vector.load %arg1[%c0, %c0_0] : memref<8x128xf32, #tpu.memory_space<vmem>>, vector<8x128xf32>
    %1 = vector.extract_strided_slice %0 {offsets = [0, 0], sizes = [1, 128], strides = [1, 1]} : vector<8x128xf32> to vector<1x128xf32>
    %2 = arith.fptosi %1 : vector<1x128xf32> to vector<1x128xi32>
    %3 = vector.extract_strided_slice %0 {offsets = [1, 0], sizes = [1, 128], strides = [1, 1]} : vector<8x128xf32> to vector<1x128xf32>
    %4 = arith.fptosi %3 : vector<1x128xf32> to vector<1x128xi32>
    %5 = vector.extract_strided_slice %0 {offsets = [2, 0], sizes = [1, 128], strides = [1, 1]} : vector<8x128xf32> to vector<1x128xf32>
    %6 = arith.fptosi %5 : vector<1x128xf32> to vector<1x128xi32>
    %7 = vector.extract_strided_slice %0 {offsets = [3, 0], sizes = [1, 128], strides = [1, 1]} : vector<8x128xf32> to vector<1x128xf32>
    %8 = arith.fptosi %7 : vector<1x128xf32> to vector<1x128xi32>
    %9 = vector.extract_strided_slice %0 {offsets = [4, 0], sizes = [1, 128], strides = [1, 1]} : vector<8x128xf32> to vector<1x128xf32>
    %10 = vector.extract_strided_slice %0 {offsets = [5, 0], sizes = [1, 128], strides = [1, 1]} : vector<8x128xf32> to vector<1x128xf32>
    %11 = vector.extract_strided_slice %0 {offsets = [6, 0], sizes = [1, 128], strides = [1, 1]} : vector<8x128xf32> to vector<1x128xf32>
    %12 = vector.extract_strided_slice %0 {offsets = [7, 0], sizes = [1, 128], strides = [1, 1]} : vector<8x128xf32> to vector<1x128xf32>
    %13 = tpu.iota {dimensions = array<i32: 0>} : vector<128x128xi32>
    %14 = vector.broadcast %2 : vector<1x128xi32> to vector<128x128xi32>
    %15 = arith.cmpi eq, %13, %14 : vector<128x128xi32>
    %cst = arith.constant 0.000000e+00 : f32
    %16 = vector.shape_cast %9 : vector<1x128xf32> to vector<1x128xf32>
    %17 = vector.broadcast %16 : vector<1x128xf32> to vector<128x128xf32>
    %18 = vector.broadcast %cst : f32 to vector<128x128xf32>
    %19 = arith.select %15, %17, %18 : vector<128x128xi1>, vector<128x128xf32>
    %20 = vector.broadcast %4 : vector<1x128xi32> to vector<128x128xi32>
    %21 = arith.cmpi eq, %13, %20 : vector<128x128xi32>
    %cst_1 = arith.constant 0.000000e+00 : f32
    %22 = vector.shape_cast %10 : vector<1x128xf32> to vector<1x128xf32>
    %23 = vector.broadcast %22 : vector<1x128xf32> to vector<128x128xf32>
    %24 = vector.broadcast %cst_1 : f32 to vector<128x128xf32>
    %25 = arith.select %21, %23, %24 : vector<128x128xi1>, vector<128x128xf32>
    %26 = arith.addf %19, %25 : vector<128x128xf32>
    %c0_2 = arith.constant 0 : index
    %c0_3 = arith.constant 0 : index
    %27 = vector.load %arg4[%c0_2, %c0_3] : memref<64x128xf32, #tpu.memory_space<vmem>>, vector<64x128xf32>
    %cst_4 = arith.constant dense<0.000000e+00> : vector<64x128xf32>
    %28 = tpu.matmul %27, %26, %cst_4 {dimension_numbers = #tpu.dot_dimension_numbers<[1], [0], [0], [1], [0, 0, 1, 1], [], []>} : vector<64x128xf32>, vector<128x128xf32>, vector<64x128xf32> -> vector<64x128xf32>
    %c0_5 = arith.constant 0 : index
    %c0_6 = arith.constant 0 : index
    %29 = vector.load %arg2[%c0_5, %c0_6] : memref<64x1xi32, #tpu.memory_space<vmem>>, vector<64x1xi32>
    %30 = vector.broadcast %29 : vector<64x1xi32> to vector<64x128xi32>
    %31 = vector.broadcast %6 : vector<1x128xi32> to vector<64x128xi32>
    %32 = arith.cmpi eq, %30, %31 : vector<64x128xi32>
    %cst_7 = arith.constant 0.000000e+00 : f32
    %33 = vector.shape_cast %11 : vector<1x128xf32> to vector<1x128xf32>
    %34 = vector.broadcast %33 : vector<1x128xf32> to vector<64x128xf32>
    %35 = vector.broadcast %cst_7 : f32 to vector<64x128xf32>
    %36 = arith.select %32, %34, %35 : vector<64x128xi1>, vector<64x128xf32>
    %37 = vector.broadcast %29 : vector<64x1xi32> to vector<64x128xi32>
    %38 = vector.broadcast %8 : vector<1x128xi32> to vector<64x128xi32>
    %39 = arith.cmpi eq, %37, %38 : vector<64x128xi32>
    %cst_8 = arith.constant 0.000000e+00 : f32
    %40 = vector.shape_cast %12 : vector<1x128xf32> to vector<1x128xf32>
    %41 = vector.broadcast %40 : vector<1x128xf32> to vector<64x128xf32>
    %42 = vector.broadcast %cst_8 : f32 to vector<64x128xf32>
    %43 = arith.select %39, %41, %42 : vector<64x128xi1>, vector<64x128xf32>
    %44 = arith.addf %36, %43 : vector<64x128xf32>
    %45 = arith.mulf %28, %44 : vector<64x128xf32>
    %c0_9 = arith.constant 0 : index
    %c0_10 = arith.constant 0 : index
    %46 = vector.load %arg3[%c0_9, %c0_10] : memref<4x64xf32, #tpu.memory_space<vmem>>, vector<4x64xf32>
    %cst_11 = arith.constant dense<0.000000e+00> : vector<4x128xf32>
    %47 = tpu.matmul %46, %45, %cst_11 {dimension_numbers = #tpu.dot_dimension_numbers<[1], [0], [0], [1], [0, 0, 1, 1], [], []>} : vector<4x64xf32>, vector<64x128xf32>, vector<4x128xf32> -> vector<4x128xf32>
    %c0_12 = arith.constant 0 : index
    %c0_13 = arith.constant 0 : index
    %48 = vector.load %arg5[%c0_12, %c0_13] : memref<4x128xf32, #tpu.memory_space<vmem>>, vector<4x128xf32>
    tpu.vector_store %arg5[%c0_12, %c0_13], %47 {strides = array<i32>} : memref<4x128xf32, #tpu.memory_space<vmem>>, vector<4x128xf32>,
    return
  }
  func.func @transform_0(%arg0: i32) -> (i32, i32) {
    %c0_i32 = arith.constant 0 : i32
    %c0_i32_0 = arith.constant 0 : i32
    return %c0_i32, %arg0 : i32, i32
  }
  func.func @transform_1(%arg0: i32) -> (i32, i32) {
    %c0_i32 = arith.constant 0 : i32
    %c0_i32_0 = arith.constant 0 : i32
    %c0_i32_1 = arith.constant 0 : i32
    return %c0_i32, %c0_i32_0 : i32, i32
  }
  func.func @transform_2(%arg0: i32) -> (i32, i32) {
    %c0_i32 = arith.constant 0 : i32
    %c0_i32_0 = arith.constant 0 : i32
    %c0_i32_1 = arith.constant 0 : i32
    return %c0_i32, %c0_i32_0 : i32, i32
  }
  func.func @transform_3(%arg0: i32) -> (i32, i32) {
    %c0_i32 = arith.constant 0 : i32
    %c0_i32_0 = arith.constant 0 : i32
    %c0_i32_1 = arith.constant 0 : i32
    return %c0_i32, %c0_i32_0 : i32, i32
  }
  func.func @transform_4(%arg0: i32) -> (i32, i32) {
    %c0_i32 = arith.constant 0 : i32
    %c0_i32_0 = arith.constant 0 : i32
    return %c0_i32, %arg0 : i32, i32
  }
}

</mosaic_0001>

<bundles_post_ra>
// kernel: tpu_custom_call.1
= control target key start
LH: loop header
LB: loop body
LE: loop exit
PB: predicated region body
PF: predicated region fallthrough
CT: control target
= control target key end

     0   :  { %9 = vsyncpa [#allocation3], 0  ;;  %s1340_s0 = inlined_call_operand.hbm [shape: f32[8,256], index: 0, kind: input, shape index: {}]   ;;  %s1341_s1 = inlined_call_operand.vmem [shape: s32[64,1], index: 1, kind: input, shape index: {}]   ;;  %s1342_s2 = inlined_call_operand.vmem [shape: f32[4,64], index: 2, kind: input, shape index: {}]   ;;  %s1343_s3 = inlined_call_operand.vmem [shape: f32[64,128], index: 3, kind: input, shape index: {}]   ;;  %s1344_s4 = inlined_call_operand.hbm [shape: f32[4,256], index: 4, kind: output, shape index: {}]  }
   0x1   :  { %11 = vsyncpa [#allocation3 + $0x1], 0 }
   0x2   :  { %12 = vsyncpa [#allocation4], 0 }
   0x3   :  { %14 = vsyncpa [#allocation4 + $0x1], 0  ;;  %s983_s15 = smov 0   ;;  %s985_s16 = smov 0  }
   0x4   :  { %s987_s17 = smov 0   ;;  %s989_s18 = smov 0  }
   0x5 LB: > { %s1004_s19 = sadd.s32 4294967295, %s951_s18   ;;  %s697_s20 = sadd.s32 4294967294, %s951_s18   ;;  %s951_s18 = sphi %s989_s18, %s1361_s18   ;;  %s947_s17 = sphi %s987_s17, %s1360_s17   ;;  %s943_s16 = sphi %s985_s16, %s1359_s16   ;;  %s939_s15 = sphi %s983_s15, %s1358_s15  }
   0x6   : > { %s1008_s21 = sadd.s32 1, %s951_s18   ;;  %s27_s22 = sadd.s32 1, %s947_s17 }
   0x7   : > { %s24_s23 = ssub.s32 %s951_s18, %s1008_s21  ;;  %p34_p0 = scmp.ne.s32.totalorder %s947_s17, %s943_s16 }
   0x8   : > { %p25_p1 = scmp.eq.s32.totalorder %s24_s23, 0  ;;  %p35_p2 = scmp.eq.s32.totalorder %s951_s18, 0 }
   0x9   : > { %p40_p3 = scmp.ne.s32.totalorder %s943_s16, %s939_s15  ;;  %p41_p4 = scmp.eq.s32.totalorder %s1004_s19, 0 }
   0xa   : > { %s1020_s24 = scalar_select %p25_p1, %s947_s17, %s27_s22  }
   0xb   : > { %p1022_p5 = por %p35_p2, %p34_p0  ;;  %p1026_p6 = por %p41_p4, %p40_p3 }
   0xc   : > { %p127_p7 = scmp.eq.s32.totalorder %s1004_s19, 1  ;;  %p133_p8 = scmp.eq.s32.totalorder %s697_s20, 1 }
   0xd   : > { %s1348_s26 = scalar_select %p1026_p6, 1, 0 }
   0xe   : > { %p820_p10 = scmp.lt.s32.totalorder %s951_s18, 2  ;;  %p1033_p11 = por %p127_p7, %p34_p0 }
   0xf   : > { %p1037_p12 = por %p133_p8, %p40_p3  ;;  %s162_s29 = sand.u32 1, %s947_s17  }
  0x10   : > { %s1349_s27 = scalar_select %p1033_p11, 1, 0 }
  0x11   : > { %s1350_s28 = scalar_select %p1037_p12, 1, 0 }
  0x12   : > { %s701_s30 = sshll.u32 %s951_s18, 7  ;;  %s700_s5 = sshll.u32 %s162_s29, 3 }
  0x13   : > { %s1046_s8 = scalar_lea.hbm %s1340_s0, %s701_s30  ;;  %s166_s9 = scalar_lea.vmem [#allocation2], %s700_s5 }
  0x14   : > { %s173_s10 = sshll.u32 %s166_s9, 4  ;;  %p1050_p13 = pnand %p820_p10, %p1022_p5  ;;  %s1054_s10 = int_to_ptr.vmem [resolvable:$true] %s173_s10 }
  0x15   : > { %s163_s12 = scalar_lea.sflag [#allocation3], %s162_s29  ;;  %s859_s13 = scalar_lea.hbm %s1046_s8, 128 }
  0x16   : > { %p860_p2 = scmp.ne.s32.totalorder %s1046_s8, %s859_s13  ;;  %p861_p3 = pneg %p1050_p13 }
  0x17   : > { %s864_s22 = scalar_lea.hbm %s1340_s0, 256  ;;  %p865_p5 = scmp.lt.s32.totalorder %s1046_s8, %s1340_s0 }
  0x18   : > { %p862_p4 = pnand %p861_p3, %p860_p2  ;;  %p866_p8 = scmp.lt.s32.totalorder %s864_s22, %s859_s13 }
  0x1a   : > { %p863_p7 = pneg %p862_p4  ;;  %p867_p10 = por %p866_p8, %p865_p5 }
  0x1c   : > { %p868_p9 = pnand %p867_p10, %p863_p7 }
  0x1e   : > { %871 = shalt.err (!%p868_p9)
}
  0x1f   : > { %s872_s29 = scalar_lea.vmem %s1054_s10, 128  ;;  %s953_s30 = smov [#allocation2]  }
  0x20   : > { %p873_p0 = scmp.ne.s32.totalorder %s1054_s10, %s872_s29  ;;  %s877_s5 = sshll.u32 %s953_s30, 4  ;;  %s878_s5 = int_to_ptr.vmem [resolvable:$false] %s877_s5 }
  0x21   : > { %s879_s6 = scalar_lea.vmem %s878_s5, 256  ;;  %p880_p4 = scmp.lt.s32.totalorder %s1054_s10, %s878_s5 }
  0x22   : > { %p875_p1 = pnand %p873_p0, %p861_p3  ;;  %p881_p12 = scmp.lt.s32.totalorder %s879_s6, %s872_s29 }
  0x24   : > { %p876_p2 = pneg %p875_p1  ;;  %p882_p11 = por %p881_p12, %p880_p4 }
  0x26   : > { %p883_p6 = pnand %p882_p11, %p876_p2 }
  0x28   : > { %886 = shalt.err (!%p883_p6)
}
  0x29   : > { %815 = dma.hbm_to_vmem [thread:$0]  (!%p1050_p13), %s1046_s8, 128, %s1054_s10, %s163_s12  }
  0x2a   : > { %p1352_p9 = scmp.lt.s32.totalorder %s951_s18, 3  ;;  %p1353_p7 = scmp.ge.s32.totalorder %s951_s18, 1 }
  0x2c   : > { %p179_p0 = pnand %p1353_p7, %p1352_p9 }
  0x2d   : > { %s1081_s7 = sand.u32 (!%p179_p0), 1, %s943_s16   ;;  %p1354_p6 = scmp.ne.s32.totalorder (!%p179_p0), %s1348_s26, 0 }
  0x2e   : > { %182 = sbr.rel (%p179_p0) target bundleno = 527 (0x20f), region = 36  ;;  %s703_s9 = sshll.u32 (!%p179_p0), %s1081_s7, 3 }
  0x2f   : > { %s185_s13 = scalar_lea.sflag (!%p179_p0), [#allocation3], %s1081_s7  ;;  %s188_s14 = scalar_lea.vmem (!%p179_p0), [#allocation2], %s703_s9 }
  0x33   : > { %930 = dma.done.wait (%p1354_p6), %s185_s13, 128  }
  0x34   : > { %932 = vsyncadd (%p1354_p6), %s185_s13, 4294967168  ;;  %v215_v0 = vlaneseq  ;;  %v954_v1 = vmov 0   ;;  %v213_v3 = vld [vmem:[%s188_s14] sm:$0xff]  ;;  %v448_v16 = vld [vmem:[%s1341_s1 + $0x38] sm:$0xff]  ;;  %s704_s26 = sshll.u32 %s1081_s7, 2  ;;  %s707_s20 = sshll.u32 %s1004_s19, 6 }
  0x35   : > { %857 = vset.pattern.permute.xlu0 %v954_v1  ;;  %858 = vset.pattern.permute.xlu1 %v954_v1  ;;  %v328_v6 = vld [vmem:[%s1343_s3] sm:$0xff]  ;;  %v806_v7 = vtrunc.f32 %v213_v3  ;;  %v446_v17 = vld [vmem:[%s1341_s1 + $0x28] sm:$0xff]  ;;  %v447_v27 = vld [vmem:[%s1341_s1 + $0x30] sm:$0xff]  ;;  %s212_s11 = scalar_lea.vmem [#allocation5], %s704_s26  ;;  %s1299_s25 = scalar_lea.hbm %s1344_s4, %s707_s20 }
  0x36   : > { %v1089_v2 = vshrl.u32 %v215_v0, 7  ;;  %775 = vmatprep.mubr.f32.mxu0 %v328_v6  ;;  %471 = vperm.xlu0 %857, %v448_v16   ;;  %v445_v28 = vld [vmem:[%s1341_s1 + $0x20] sm:$0xff]  ;;  %v444_v41 = vld [vmem:[%s1341_s1 + $0x18] sm:$0xff]  ;;  %v443_v44 = vld [vmem:[%s1341_s1 + $0x10] sm:$0xff]  ;;  %s627_s12 = sshll.u32 %s212_s11, 4  ;;  %s614_s29 = scalar_lea.sflag [#allocation4], %s1081_s7  ;;  %s1294_s12 = int_to_ptr.vmem [resolvable:$true] %s627_s12 }
  0x37   : > { %v807_v15 = vcvt.f32.s32 %v806_v7  ;;  %465 = vperm.xlu1 %858, %v446_v17   ;;  %v442_v52 = vld [vmem:[%s1341_s1 + $0x8] sm:$0xff]  ;;  %v441_v55 = vld [vmem:[%s1341_s1] sm:$0xff]  ;;  %s887_s30 = scalar_lea.vmem %s1294_s12, 64  ;;  %p1355_p12 = scmp.ne.s32.totalorder %s1349_s27, 0 }
  0x38   : > { %v254_v4 = vsub.s32 4, %v1089_v2  ;;  %v294_v5 = vsub.s32 5, %v1089_v2  ;;  %v231_v8 = vadd.s32 120, %v1089_v2  ;;  %v234_v9 = vsub.s32 0, %v1089_v2  ;;  %p888_p11 = scmp.ne.s32.totalorder %s1294_s12, %s887_s30  ;;  %s957_s19 = smov [#allocation5]  }
  0x39   : > { %v274_v10 = vsub.s32 1, %v1089_v2  ;;  %v230_v11 = vadd.s32 112, %v1089_v2  ;;  %v229_v12 = vadd.s32 104, %v1089_v2  ;;  %v228_v13 = vadd.s32 96, %v1089_v2  ;;  %s891_s5 = sshll.u32 %s957_s19, 4  ;;  %s892_s5 = int_to_ptr.vmem [resolvable:$false] %s891_s5 }
  0x3a   : > { %v475_v14 = vsub.s32 2, %v1089_v2  ;;  %v487_v18 = vsub.s32 6, %v1089_v2  ;;  %v499_v19 = vsub.s32 3, %v1089_v2  ;;  %v511_v20 = vsub.s32 7, %v1089_v2  ;;  %468 = vperm.xlu0 %857, %v447_v27   ;;  %p889_p13 = pnand %p888_p11, %p1355_p12  ;;  %s893_s6 = scalar_lea.vmem %s892_s5, 128 }
  0x3b   : > { %v1112_v21 = vrot.slane %v213_v3, %v254_v4  ;;  %v1114_v22 = vrot.slane %v213_v3, %v294_v5  ;;  %v227_v23 = vadd.s32 88, %v1089_v2  ;;  %v226_v24 = vadd.s32 80, %v1089_v2  ;;  %462 = vperm.xlu1 %858, %v445_v28   ;;  %p894_p3 = scmp.lt.s32.totalorder %s1294_s12, %s892_s5  ;;  %p895_p5 = scmp.lt.s32.totalorder %s893_s6, %s887_s30 }
  0x3c   : > { %v1118_v25 = vrot.slane %v807_v15, %v234_v9  ;;  %v1120_v26 = vrot.slane %v807_v15, %v274_v10  ;;  %v1128_v29 = vrot.slane %v807_v15, %v475_v14  ;;  %v1130_v30 = vrot.slane %v213_v3, %v487_v18  ;;  %p890_p1 = pneg %p889_p13 }
  0x3d   : > { %v225_v31 = vadd.s32 72, %v1089_v2  ;;  %v1134_v32 = vadd.s32 64, %v1089_v2  ;;  %v1136_v33 = vrot.slane %v807_v15, %v499_v19  ;;  %v1138_v34 = vrot.slane %v213_v3, %v511_v20  ;;  %p896_p8 = por %p895_p5, %p894_p3 }
  0x3e   : > { %vm251_vm0 = vcmp.eq.s32.totalorder %v231_v8, %v1118_v25  ;;  %vm291_vm1 = vcmp.eq.s32.totalorder %v231_v8, %v1120_v26  ;;  %vm250_vm2 = vcmp.eq.s32.totalorder %v230_v11, %v1118_v25  ;;  %vm290_vm3 = vcmp.eq.s32.totalorder %v230_v11, %v1120_v26  ;;  %459 = vperm.xlu0 %857, %v444_v41  }
  0x3f   : > { %v271_v35 = vsel %vm251_vm0, %v1112_v21, 0.0  ;;  %v311_v36 = vsel %vm291_vm1, %v1114_v22, 0.0  ;;  %v270_v37 = vsel %vm250_vm2, %v1112_v21, 0.0  ;;  %v310_v38 = vsel %vm290_vm3, %v1114_v22, 0.0  ;;  %456 = vperm.xlu1 %858, %v443_v44   ;;  %p897_p10 = pnand %p896_p8, %p890_p1 }
  0x40   : > { %v327_v39 = vadd.f32 %v311_v36, %v271_v35  ;;  %v326_v40 = vadd.f32 %v310_v38, %v270_v37  ;;  %vm249_vm4 = vcmp.eq.s32.totalorder %v229_v12, %v1118_v25  ;;  %vm289_vm5 = vcmp.eq.s32.totalorder %v229_v12, %v1120_v26  ;;  %v333_v38 = vld [vmem:[%s1343_s3 + $0x28] sm:$0xff] }
  0x41   : > { %v269_v42 = vsel %vm249_vm4, %v1112_v21, 0.0  ;;  %v309_v43 = vsel %vm289_vm5, %v1114_v22, 0.0  ;;  %vm248_vm6 = vcmp.eq.s32.totalorder %v228_v13, %v1118_v25  ;;  %vm288_vm7 = vcmp.eq.s32.totalorder %v228_v13, %v1120_v26 }
  0x42   : > { %743 = vmatprep.subr.mxu0 %v327_v39  ;;  %v325_v45 = vadd.f32 %v309_v43, %v269_v42  ;;  %v268_v46 = vsel %vm248_vm6, %v1112_v21, 0.0  ;;  %v308_v47 = vsel %vm288_vm7, %v1114_v22, 0.0  ;;  %vm247_vm8 = vcmp.eq.s32.totalorder %v227_v23, %v1118_v25  ;;  %453 = vperm.xlu0 %857, %v442_v52  }
  0x43   : > { %744 = vmatpush3.msra.mxu0 %v327_v39  ;;  %v267_v48 = vsel %vm247_vm8, %v1112_v21, 0.0  ;;  %vm287_vm9 = vcmp.eq.s32.totalorder %v227_v23, %v1120_v26  ;;  %vm246_vm10 = vcmp.eq.s32.totalorder %v226_v24, %v1118_v25  ;;  %v223_v49 = vadd.s32 56, %v1089_v2  ;;  %450 = vperm.xlu1 %858, %v441_v55   ;;  %v334_v39 = vld [vmem:[%s1343_s3 + $0x30] sm:$0xff] }
  0x44   : > { %745 = vmatprep.subr.mxu0 %v326_v40  ;;  %v324_v50 = vadd.f32 %v308_v47, %v268_v46  ;;  %v307_v51 = vsel %vm287_vm9, %v1114_v22, 0.0  ;;  %vm286_vm11 = vcmp.eq.s32.totalorder %v226_v24, %v1120_v26  ;;  %vm245_vm12 = vcmp.eq.s32.totalorder %v225_v31, %v1118_v25 }
  0x45   : > { %746 = vmatpush3.msra.mxu0 %v326_v40  ;;  %v266_v53 = vsel %vm246_vm10, %v1112_v21, 0.0  ;;  %v306_v54 = vsel %vm286_vm11, %v1114_v22, 0.0  ;;  %vm285_vm13 = vcmp.eq.s32.totalorder %v225_v31, %v1120_v26  ;;  %v323_v56 = vadd.f32 %v307_v51, %v267_v48  ;;  %v335_v40 = vld [vmem:[%s1343_s3 + $0x38] sm:$0xff] }
  0x46   : > { %747 = vmatprep.subr.mxu0 %v325_v45  ;;  %vm244_vm14 = vcmp.eq.s32.totalorder %v1134_v32, %v1118_v25  ;;  %vm284_vm15 = vcmp.eq.s32.totalorder %v1134_v32, %v1120_v26  ;;  %v222_v57 = vadd.s32 48, %v1089_v2  ;;  %v265_v58 = vsel %vm245_vm12, %v1112_v21, 0.0 }
  0x47   : > { %748 = vmatpush3.msra.mxu0 %v325_v45  ;;  %v305_v59 = vsel %vm285_vm13, %v1114_v22, 0.0  ;;  %v322_v60 = vadd.f32 %v306_v54, %v266_v53  ;;  %vm243_vm0 = vcmp.eq.s32.totalorder %v223_v49, %v1118_v25  ;;  %vm283_vm1 = vcmp.eq.s32.totalorder %v223_v49, %v1120_v26 }
  0x48   : > { %749 = vmatprep.subr.mxu0 %v324_v50  ;;  %v221_v61 = vadd.s32 40, %v1089_v2  ;;  %v264_v62 = vsel %vm244_vm14, %v1112_v21, 0.0  ;;  %v304_v63 = vsel %vm284_vm15, %v1114_v22, 0.0  ;;  %v321_v0 = vadd.f32 %v305_v59, %v265_v58 }
  0x49   : > { %750 = vmatpush3.msra.mxu0 %v324_v50  ;;  %vm242_vm2 = vcmp.eq.s32.totalorder %v222_v57, %v1118_v25  ;;  %vm282_vm3 = vcmp.eq.s32.totalorder %v222_v57, %v1120_v26  ;;  %v220_v1 = vadd.s32 32, %v1089_v2  ;;  %v263_v3 = vsel %vm243_vm0, %v1112_v21, 0.0 }
  0x4a   : > { %751 = vmatprep.subr.mxu0 %v323_v56  ;;  %v303_v4 = vsel %vm283_vm1, %v1114_v22, 0.0  ;;  %v320_v5 = vadd.f32 %v304_v63, %v264_v62  ;;  %vm241_vm4 = vcmp.eq.s32.totalorder %v221_v61, %v1118_v25  ;;  %vm281_vm5 = vcmp.eq.s32.totalorder %v221_v61, %v1120_v26 }
  0x4b   : > { %752 = vmatpush3.msra.mxu0 %v323_v56  ;;  %v219_v6 = vadd.s32 24, %v1089_v2  ;;  %v262_v7 = vsel %vm242_vm2, %v1112_v21, 0.0  ;;  %v302_v8 = vsel %vm282_vm3, %v1114_v22, 0.0  ;;  %v319_v9 = vadd.f32 %v303_v4, %v263_v3 }
  0x4c   : > { %753 = vmatprep.subr.mxu0 %v322_v60  ;;  %vm240_vm6 = vcmp.eq.s32.totalorder %v220_v1, %v1118_v25  ;;  %vm280_vm7 = vcmp.eq.s32.totalorder %v220_v1, %v1120_v26  ;;  %v218_v10 = vadd.s32 16, %v1089_v2  ;;  %v261_v11 = vsel %vm241_vm4, %v1112_v21, 0.0 }
  0x4d   : > { %754 = vmatpush3.msra.mxu0 %v322_v60  ;;  %v301_v12 = vsel %vm281_vm5, %v1114_v22, 0.0  ;;  %v318_v13 = vadd.f32 %v302_v8, %v262_v7  ;;  %vm239_vm8 = vcmp.eq.s32.totalorder %v219_v6, %v1118_v25  ;;  %vm279_vm9 = vcmp.eq.s32.totalorder %v219_v6, %v1120_v26 }
  0x4e   : > { %755 = vmatprep.subr.mxu0 %v321_v0  ;;  %v217_v14 = vadd.s32 8, %v1089_v2  ;;  %v260_v15 = vsel %vm240_vm6, %v1112_v21, 0.0  ;;  %v300_v16 = vsel %vm280_vm7, %v1114_v22, 0.0  ;;  %v317_v17 = vadd.f32 %v301_v12, %v261_v11 }
  0x4f   : > { %756 = vmatpush3.msra.mxu0 %v321_v0  ;;  %vm238_vm10 = vcmp.eq.s32.totalorder %v218_v10, %v1118_v25  ;;  %vm278_vm11 = vcmp.eq.s32.totalorder %v218_v10, %v1120_v26  ;;  %v259_v18 = vsel %vm239_vm8, %v1112_v21, 0.0  ;;  %v299_v19 = vsel %vm279_vm9, %v1114_v22, 0.0 }
  0x50   : > { %757 = vmatprep.subr.mxu0 %v320_v5  ;;  %v316_v20 = vadd.f32 %v300_v16, %v260_v15  ;;  %vm237_vm12 = vcmp.eq.s32.totalorder %v217_v14, %v1118_v25  ;;  %vm277_vm13 = vcmp.eq.s32.totalorder %v217_v14, %v1120_v26  ;;  %v258_v23 = vsel %vm238_vm10, %v1112_v21, 0.0 }
  0x51   : > { %758 = vmatpush3.msra.mxu0 %v320_v5  ;;  %v298_v24 = vsel %vm278_vm11, %v1114_v22, 0.0  ;;  %v315_v27 = vadd.f32 %v299_v19, %v259_v18  ;;  %vm236_vm14 = vcmp.eq.s32.totalorder %v1089_v2, %v1118_v25  ;;  %vm276_vm15 = vcmp.eq.s32.totalorder %v1089_v2, %v1120_v26  ;;  %v329_v2 = vld [vmem:[%s1343_s3 + $0x8] sm:$0xff]  ;;  %v330_v26 = vld [vmem:[%s1343_s3 + $0x10] sm:$0xff] }
  0x52   : > { %759 = vmatprep.subr.mxu0 %v319_v9  ;;  %v257_v28 = vsel %vm237_vm12, %v1112_v21, 0.0  ;;  %v297_v31 = vsel %vm277_vm13, %v1114_v22, 0.0  ;;  %v314_v32 = vadd.f32 %v298_v24, %v258_v23  ;;  %v256_v35 = vsel %vm236_vm14, %v1112_v21, 0.0  ;;  %v331_v21 = vld [vmem:[%s1343_s3 + $0x18] sm:$0xff] }
  0x53   : > { %760 = vmatpush3.msra.mxu0 %v319_v9  ;;  %v296_v36 = vsel %vm276_vm15, %v1114_v22, 0.0  ;;  %v313_v37 = vadd.f32 %v297_v31, %v257_v28  ;;  %v332_v22 = vld [vmem:[%s1343_s3 + $0x20] sm:$0xff]  ;;  %v955_v41 = vmov 0.0   ;;  %vm956_vm10 = vmmov 0  }
  0x54   : > { %761 = vmatprep.subr.mxu0 %v318_v13  ;;  %v312_v25 = vadd.f32 %v296_v36, %v256_v35  ;;  %787 = vmatprep.subr.mxu1 %v955_v41 }
  0x55   : > { %762 = vmatpush3.msra.mxu0 %v318_v13  ;;  %803 = vmatprep.mubr.msk.f32.mxu1 %vm956_vm10, %v955_v41 }
  0x56   : > { %763 = vmatprep.subr.mxu0 %v317_v17 }
  0x57   : > { %764 = vmatpush3.msra.mxu0 %v317_v17 }
  0x58   : > { %765 = vmatprep.subr.mxu0 %v316_v20 }
  0x59   : > { %766 = vmatpush3.msra.mxu0 %v316_v20 }
  0x5a   : > { %767 = vmatprep.subr.mxu0 %v315_v27 }
  0x5b   : > { %768 = vmatpush3.msra.mxu0 %v315_v27  ;;  %v537_v27 = vld [vmem:[%s1342_s2] sm:$0xf] }
  0x5c   : > { %769 = vmatprep.subr.mxu0 %v314_v32 }
  0x5d   : > { %770 = vmatpush3.msra.mxu0 %v314_v32 }
  0x5e   : > { %771 = vmatprep.subr.mxu0 %v313_v37 }
  0x5f   : > { %772 = vmatpush3.msra.mxu0 %v313_v37 }
  0x60   : > { %773 = vmatprep.subr.mxu0 %v312_v25 }
  0x61   : > { %774 = vmatpush3.msra.mxu0 %v312_v25 }
  0x62   : > { %776 = vmatmul.mubr.f32.vlgmr.msra.gmra.mxu0 %v329_v2 }
  0x63   : > { %778 = vmatprep.mubr.f32.mxu0 %v330_v26 }
  0x66   : > { %779 = vmatmul.mubr.f32.gmra.mxu0 %v331_v21 }
  0x67   : > { %781 = vmatprep.mubr.f32.mxu0 %v332_v22 }
  0x6a   : > { %782 = vmatmul.mubr.f32.gmra.mxu0 %v333_v38 }
  0x6b   : > { %784 = vmatprep.mubr.f32.mxu0 %v334_v39 }
  0x6e   : > { %785 = vmatmul.mubr.f32.gmra.mxu0 %v335_v40 }
  0xb1   : > { %v472_v42 = vpop.permute.xlu0 %471 }
  0xb2   : > { %v466_v43 = vpop.permute.xlu1 %465  ;;  %vm484_vm0 = vcmp.eq.s32.totalorder %v472_v42, %v1128_v29  ;;  %vm508_vm1 = vcmp.eq.s32.totalorder %v472_v42, %v1136_v33 }
  0xb3   : > { %vm482_vm2 = vcmp.eq.s32.totalorder %v466_v43, %v1128_v29  ;;  %vm506_vm3 = vcmp.eq.s32.totalorder %v466_v43, %v1136_v33  ;;  %v496_v44 = vsel %vm484_vm0, %v1130_v30, 0.0  ;;  %v520_v45 = vsel %vm508_vm1, %v1138_v34, 0.0 }
  0xb4   : > { %v494_v46 = vsel %vm482_vm2, %v1130_v30, 0.0  ;;  %v518_v47 = vsel %vm506_vm3, %v1138_v34, 0.0  ;;  %v528_v49 = vadd.f32 %v520_v45, %v496_v44  ;;  %vm538_vm1 = vcmask 523264  }
  0xb5   : > { %v526_v48 = vadd.f32 %v518_v47, %v494_v46  ;;  %v469_v50 = vpop.permute.xlu0 %468 }
  0xb6   : > { %v463_v51 = vpop.permute.xlu1 %462  ;;  %vm483_vm4 = vcmp.eq.s32.totalorder %v469_v50, %v1128_v29  ;;  %vm507_vm5 = vcmp.eq.s32.totalorder %v469_v50, %v1136_v33 }
  0xb7   : > { %vm481_vm6 = vcmp.eq.s32.totalorder %v463_v51, %v1128_v29  ;;  %vm505_vm7 = vcmp.eq.s32.totalorder %v463_v51, %v1136_v33  ;;  %v495_v52 = vsel %vm483_vm4, %v1130_v30, 0.0  ;;  %v519_v53 = vsel %vm507_vm5, %v1138_v34, 0.0 }
  0xb8   : > { %v493_v54 = vsel %vm481_vm6, %v1130_v30, 0.0  ;;  %v517_v55 = vsel %vm505_vm7, %v1138_v34, 0.0  ;;  %v527_v57 = vadd.f32 %v519_v53, %v495_v52 }
  0xb9   : > { %v525_v56 = vadd.f32 %v517_v55, %v493_v54  ;;  %v460_v58 = vpop.permute.xlu0 %459 }
  0xba   : > { %vm480_vm8 = vcmp.eq.s32.totalorder %v460_v58, %v1128_v29  ;;  %vm504_vm9 = vcmp.eq.s32.totalorder %v460_v58, %v1136_v33  ;;  %v457_v59 = vpop.permute.xlu1 %456 }
  0xbb   : > { %v492_v60 = vsel %vm480_vm8, %v1130_v30, 0.0  ;;  %v516_v61 = vsel %vm504_vm9, %v1138_v34, 0.0  ;;  %vm479_vm11 = vcmp.eq.s32.totalorder %v457_v59, %v1128_v29  ;;  %vm503_vm12 = vcmp.eq.s32.totalorder %v457_v59, %v1136_v33 }
  0xbc   : > { %v491_v62 = vsel %vm479_vm11, %v1130_v30, 0.0  ;;  %v515_v63 = vsel %vm503_vm12, %v1138_v34, 0.0  ;;  %v524_v0 = vadd.f32 %v516_v61, %v492_v60 }
  0xbd   : > { %v454_v1 = vpop.permute.xlu0 %453  ;;  %v523_v3 = vadd.f32 %v515_v63, %v491_v62 }
  0xbe   : > { %vm478_vm13 = vcmp.eq.s32.totalorder %v454_v1, %v1128_v29  ;;  %vm502_vm14 = vcmp.eq.s32.totalorder %v454_v1, %v1136_v33  ;;  %v451_v4 = vpop.permute.xlu1 %450 }
  0xbf   : > { %v490_v5 = vsel %vm478_vm13, %v1130_v30, 0.0  ;;  %v514_v6 = vsel %vm502_vm14, %v1138_v34, 0.0  ;;  %vm477_vm15 = vcmp.eq.s32.totalorder %v451_v4, %v1128_v29  ;;  %vm501_vm0 = vcmp.eq.s32.totalorder %v451_v4, %v1136_v33 }
  0xc0   : > { %v489_v7 = vsel %vm477_vm15, %v1130_v30, 0.0  ;;  %v513_v8 = vsel %vm501_vm0, %v1138_v34, 0.0  ;;  %v522_v9 = vadd.f32 %v514_v6, %v490_v5 }
  0xc1   : > { %v521_v10 = vadd.f32 %v513_v8, %v489_v7 }
 0x122   : > { %v777_v11 = vpop.f32.mrf.mxu0 }
 0x123   : > { %v530_v23 = vmul.f32 %v777_v11, %v522_v9 }
 0x124   : > { %v402_v12 = vpop.f32.mrf.mxu0 }
 0x125   : > { %v529_v24 = vmul.f32 %v521_v10, %v402_v12 }
 0x126   : > { %v780_v13 = vpop.f32.mrf.mxu0 }
 0x127   : > { %v532_v33 = vmul.f32 %v780_v13, %v524_v0 }
 0x128   : > { %v412_v14 = vpop.f32.mrf.mxu0 }
 0x129   : > { %v531_v34 = vmul.f32 %v523_v3, %v412_v14 }
 0x12a   : > { %v783_v15 = vpop.f32.mrf.mxu0 }
 0x12b   : > { %v534_v29 = vmul.f32 %v783_v15, %v526_v48 }
 0x12c   : > { %v422_v16 = vpop.f32.mrf.mxu0 }
 0x12d   : > { %v533_v30 = vmul.f32 %v525_v56, %v422_v16 }
 0x12e   : > { %v786_v17 = vpop.f32.mrf.mxu0 }
 0x12f   : > { %v536_v18 = vmul.f32 %v786_v17, %v528_v49 }
 0x130   : > { %v432_v19 = vpop.f32.mrf.mxu0 }
 0x131   : > { %v535_v20 = vmul.f32 %v527_v57, %v432_v19  ;;  %788 = vmatpush3.msra.mxu1 %v536_v18 }
 0x132   : > { %789 = vmatprep.subr.mxu1 %v955_v41 }
 0x133   : > { %790 = vmatpush3.msra.mxu1 %v535_v20 }
 0x134   : > { %791 = vmatprep.subr.mxu1 %v955_v41 }
 0x135   : > { %792 = vmatpush3.msra.mxu1 %v534_v29 }
 0x136   : > { %793 = vmatprep.subr.mxu1 %v955_v41 }
 0x137   : > { %794 = vmatpush3.msra.mxu1 %v533_v30 }
 0x138   : > { %795 = vmatprep.subr.mxu1 %v955_v41 }
 0x139   : > { %796 = vmatpush3.msra.mxu1 %v532_v33 }
 0x13a   : > { %797 = vmatprep.subr.mxu1 %v955_v41 }
 0x13b   : > { %798 = vmatpush3.msra.mxu1 %v531_v34 }
 0x13c   : > { %799 = vmatprep.subr.mxu1 %v955_v41 }
 0x13d   : > { %800 = vmatpush3.msra.mxu1 %v530_v23 }
 0x13e   : > { %801 = vmatprep.subr.mxu1 %v955_v41 }
 0x13f   : > { %802 = vmatpush3.msra.mxu1 %v529_v24 }
 0x140   : > { %804 = vmatmul.mubr.msk.f32.vlgmr.msra.gmra.mxu1 %vm538_vm1, %v537_v27 }
 0x200   : > { %v608_v28 = vpop.f32.mrf.mxu1 }
 0x201   : > { %612 = vst [vmem:[%s212_s11] sm:$0xf] %v608_v28 }
 0x202   : > { %v805_v31 = vpop.f32.mrf.mxu1 }
 0x203   : > { %900 = shalt.err (!%p897_p10)
}
 0x204   : > { %s901_s9 = scalar_lea.hbm %s1299_s25, 64  ;;  %s905_s14 = scalar_lea.hbm %s1344_s4, 128 }
 0x205   : > { %p902_p2 = scmp.ne.s32.totalorder %s1299_s25, %s901_s9  ;;  %p906_p7 = scmp.lt.s32.totalorder %s1299_s25, %s1344_s4 }
 0x206   : > { %p907_p0 = scmp.lt.s32.totalorder %s905_s14, %s901_s9 }
 0x207   : > { %p903_p4 = pnand %p902_p2, %p1355_p12 }
 0x208   : > { %p908_p6 = por %p907_p0, %p906_p7 }
 0x209   : > { %p904_p9 = pneg %p903_p4 }
 0x20b   : > { %p909_p11 = pnand %p908_p6, %p904_p9 }
 0x20d   : > { %912 = shalt.err (!%p909_p11)
}
 0x20e   : > { %810 = dma.vmem_to_hbm [thread:$0]  (%p1355_p12), %s1294_s12, 64, %s1299_s25, %s614_s29  }
 0x20f PF: > { %s639_s26 = sand.u32 1, %s939_s15   ;;  %p1356_p13 = scmp.ne.s32.totalorder %s1350_s28, 0 }
 0x210   : > { %p1357_p1 = scmp.ge.s32.totalorder %s951_s18, 2  ;;  %s640_s11 = scalar_lea.sflag [#allocation4], %s639_s26 }
 0x212   : > { %p817_p3 = pnand %p1357_p1, %p1356_p13 }
 0x214   : > { %p818_p5 = pneg %p817_p3 }
 0x216   : > { %934 = dma.done.wait (%p818_p5), %s640_s11, 64  }
 0x217   : > { %936 = vsyncadd (%p818_p5), %s640_s11, 4294967232  ;;  %p17_p8 = scmp.ge.s32.totalorder %s1008_s21, 4   ;;  %s1358_s15 = smov %s943_s16 }
 0x218   : > { %s1359_s16 = smov %s947_s17  ;;  %s1360_s17 = smov %s1020_s24 }
 0x219   : > { %s1361_s18 = smov %s1008_s21  ;;  %19 = sbr.rel (!%p17_p8) target bundleno = 5 (0x5), region = 81 }
 0x21e   :  { %645 = vsyncpa [#allocation3], 1 }
 0x21f   :  { %647 = vsyncpa [#allocation3 + $0x1], 1 }
 0x220   :  { %648 = vsyncpa [#allocation4], 1 }
 0x221   :  { %650 = vsyncpa [#allocation4 + $0x1], 1 }

</bundles_post_ra>
